<compile_context>
chip_gen: v7x
topology: tpu7x:2x2x1
jax: 0.10.0
libtpu: 0.0.40
codegen_flags: <defaults>
</compile_context>

<pallas_src>
import functools

import jax
import jax.numpy as jnp
from jax.experimental import pallas as pl
from jax.experimental.pallas import tpu as pltpu


def _round_up(x, m):
    return (x + m - 1) // m * m


# ------------------------- Pallas kernel -------------------------

def irazor_dnn_kernel(ids_ref, rhs_ref, b1_ref, w2_ref, b2_ref, wp_ref, bp_ref,
                      emb_ref, dnn_ref, *, h2_col):
    TB, F = ids_ref.shape
    K_pad = rhs_ref.shape[0]
    D_pad = emb_ref.shape[1]

    ids = ids_ref[...]                                  # [TB, F] int32, pre-offset by f*V_stride
    iota_k = jax.lax.broadcasted_iota(jnp.int32, (TB, K_pad), 1)

    # One-hot over the stacked (per-field) table rows.  Field row-blocks are
    # disjoint, so OR-ing the per-field compares gives exactly F ones per row.
    oh = ids[:, 0:1] == iota_k
    for f in range(1, F):                               # static, tiny field count
        oh = oh | (ids[:, f:f + 1] == iota_k)
    oh = oh.astype(rhs_ref.dtype)                       # bf16 one-hot (0/1 exact)

    # Single fused MXU pass: lanes [0, D_pad) = packed scaled embeddings,
    # lanes [D_pad, D_pad+H1_pad) = layer-1 pre-activations (summed over fields).
    fused = jnp.dot(oh, rhs_ref[...], preferred_element_type=jnp.float32)
    emb_ref[...] = fused[:, :D_pad]                     # lane-dense packed id_emb store

    # MLP: bias + ReLU, Linear + bias + ReLU (BN / dropout are inference identity).
    h1 = jnp.maximum(fused[:, D_pad:] + b1_ref[...], 0.0)
    h2 = jnp.maximum(jnp.dot(h1.astype(w2_ref.dtype), w2_ref[...],
                             preferred_element_type=jnp.float32) + b2_ref[...], 0.0)

    # predict_dense (H2 -> 1) as VPU multiply + lane reduction; the logit is
    # written into the spare padded column `h2_col` of the dnn output (no
    # separate 1-lane-wide output stream / masked vst).
    logit = jnp.sum(h2 * wp_ref[...], axis=-1, keepdims=True) + bp_ref[...]
    lane = jax.lax.broadcasted_iota(jnp.int32, h2.shape, 1)
    dnn_ref[...] = jnp.where(lane == h2_col, logit, h2)


# ------------------------- wrapper -------------------------

def irazor_dnn_forward(input_ids, params, *, field_num, regions_dims, temperature,
                       block_batch=1024, compute_dtype=jnp.bfloat16):
    """Returns (logits, {'id_emb': ..., 'dnn_out': ...}) matching the torch module."""
    f32 = jnp.float32
    all_dim = sum(regions_dims)
    B, F = input_ids.shape
    assert F == field_num
    V = params["emb_table"].shape[0]
    H1 = params["w1"].shape[1]
    H2 = params["w2"].shape[1]

    # lane/sublane-friendly padded sizes
    D_pad = _round_up(F * all_dim, 128)          # packed id_emb lanes
    H1_pad = _round_up(H1, 128)
    H2_pad = _round_up(H2 + 1, 128)              # +1 guarantees a spare column for the logit
    V_stride = _round_up(V, 8)                   # per-field row stride in the stacked RHS
    K_pad = _round_up(F * V_stride, 128)
    N_fused = D_pad + H1_pad

    # ---- i-Razor region probabilities -> per-(field, dim) soft scale (tiny glue) ----
    alpha = jax.nn.softmax(params["region_logits"].astype(f32) / temperature, axis=-1)  # [F, R]
    cum = jnp.cumsum(jnp.asarray(regions_dims))
    mask = (jnp.arange(all_dim)[None, :] < cum[:, None]).astype(f32)                    # [R, all_dim]
    scale = alpha @ mask                                                                # [F, all_dim]

    # ---- build the block-structured fused RHS: scale folded into the table,
    #      layer-1 folded in as W_eff[f] = (table*scale[f]) @ w1[f] ----
    table = params["emb_table"].astype(f32)                        # [V, all_dim]
    w1_3 = params["w1"].astype(f32).reshape(F, all_dim, H1)
    rhs = jnp.zeros((K_pad, N_fused), f32)
    for f in range(F):                                             # static, tiny field count
        tbl_f = table * scale[f][None, :]                          # [V, all_dim]
        r0 = f * V_stride
        rhs = rhs.at[r0:r0 + V, f * all_dim:(f + 1) * all_dim].set(tbl_f)
        rhs = rhs.at[r0:r0 + V, D_pad:D_pad + H1].set(tbl_f @ w1_3[f])
    rhs = rhs.astype(compute_dtype)

    b1_pad = jnp.zeros((1, H1_pad), f32).at[:, :H1].set(params["b1"].astype(f32).reshape(1, H1))
    w2_pad = jnp.zeros((H1_pad, H2_pad), f32).at[:H1, :H2].set(
        params["w2"].astype(f32)).astype(compute_dtype)
    b2_pad = jnp.zeros((1, H2_pad), f32).at[:, :H2].set(params["b2"].astype(f32).reshape(1, H2))
    wp_row = jnp.zeros((1, H2_pad), f32).at[:, :H2].set(
        params["wp"].astype(f32)[:, 0][None, :])
    bp = params["bp"].astype(f32).reshape(1, 1)

    # ---- batch tiling: TB multiple of 8, capped at ~B/2 so the grid has >= 2
    #      tiles whenever possible (keeps both v7x TensorCores busy). ----
    block_batch = _round_up(max(block_batch, 8), 8)
    B8 = _round_up(B, 8)
    TB = min(block_batch, _round_up((B8 + 1) // 2, 8))
    B_pad = _round_up(B, TB)

    ids_off = input_ids.astype(jnp.int32) + (
        jnp.arange(F, dtype=jnp.int32) * V_stride)[None, :]        # pre-offset ids
    if B_pad != B:
        ids_off = jnp.zeros((B_pad, F), jnp.int32).at[:B].set(ids_off)  # row 0 is a valid id

    grid = (pl.cdiv(B_pad, TB),)

    out_shapes = (
        jax.ShapeDtypeStruct((B_pad, D_pad), f32),    # packed id_emb (lanes 0..F*all_dim valid)
        jax.ShapeDtypeStruct((B_pad, H2_pad), f32),   # dnn_out (cols 0..H2) + logit (col H2)
    )

    kernel = functools.partial(irazor_dnn_kernel, h2_col=H2)

    # Note: resident inputs could use pipeline_mode=pl.Buffered(1) to drop one
    # redundant double-buffer (~0.3 MB); omitted to stay on the most portable
    # BlockSpec API surface.
    emb_packed, dnn_pad = pl.pallas_call(
        kernel,
        out_shape=out_shapes,
        grid=grid,
        in_specs=[
            pl.BlockSpec((TB, F), lambda i: (i, 0)),              # ids: streamed per tile
            pl.BlockSpec((K_pad, N_fused), lambda i: (0, 0)),     # fused RHS: resident
            pl.BlockSpec((1, H1_pad), lambda i: (0, 0)),          # b1
            pl.BlockSpec((H1_pad, H2_pad), lambda i: (0, 0)),     # w2
            pl.BlockSpec((1, H2_pad), lambda i: (0, 0)),          # b2
            pl.BlockSpec((1, H2_pad), lambda i: (0, 0)),          # wp (row)
            pl.BlockSpec((1, 1), lambda i: (0, 0)),               # bp
        ],
        out_specs=(
            pl.BlockSpec((TB, D_pad), lambda i: (i, 0)),
            pl.BlockSpec((TB, H2_pad), lambda i: (i, 0)),
        ),
        compiler_params=pltpu.CompilerParams(
            dimension_semantics=("parallel",),
            vmem_limit_bytes=32 * 1024 * 1024,
        ),
    )(ids_off, rhs, b1_pad, w2_pad, b2_pad, wp_row, bp)

    id_emb = emb_packed[:B, :F * all_dim].reshape(B, F, all_dim)
    dnn_out = dnn_pad[:B, :H2]
    logits = jnp.squeeze(dnn_pad[:B, H2:H2 + 1])      # matches torch.squeeze (all unit dims)
    return logits, {"id_emb": id_emb, "dnn_out": dnn_out}


# ------------------------- parameter init -------------------------

def init_params(key, *, id_feat_size, field_num, regions_dims, emb_out_dim, mlp_dims):
    all_dim = sum(regions_dims)
    ks = jax.random.split(key, 8)
    params = {}
    params["emb_table"] = jax.random.uniform(
        ks[0], (id_feat_size, all_dim), jnp.float32, minval=-0.05, maxval=0.05)
    params["region_logits"] = 0.1 * jax.random.normal(
        ks[1], (field_num, len(regions_dims)), jnp.float32)
    lim1 = 1.0 / jnp.sqrt(emb_out_dim)
    params["w1"] = jax.random.uniform(ks[2], (emb_out_dim, mlp_dims[0]),
                                      jnp.float32, minval=-lim1, maxval=lim1)
    params["b1"] = jax.random.uniform(ks[3], (1, mlp_dims[0]),
                                      jnp.float32, minval=-lim1, maxval=lim1)
    lim2 = 1.0 / jnp.sqrt(mlp_dims[0])
    params["w2"] = jax.random.uniform(ks[4], (mlp_dims[0], mlp_dims[1]),
                                      jnp.float32, minval=-lim2, maxval=lim2)
    params["b2"] = jax.random.uniform(ks[5], (1, mlp_dims[1]),
                                      jnp.float32, minval=-lim2, maxval=lim2)
    limp = 1.0 / jnp.sqrt(mlp_dims[1])
    params["wp"] = jax.random.uniform(ks[6], (mlp_dims[1], 1),
                                      jnp.float32, minval=-limp, maxval=limp)
    params["bp"] = jax.random.uniform(ks[7], (1, 1),
                                      jnp.float32, minval=-limp, maxval=limp)
    return params


# ------------------------- pure-JAX reference -------------------------

def reference_forward(input_ids, params, *, field_num, regions_dims, temperature):
    all_dim = sum(regions_dims)
    B = input_ids.shape[0]
    raw = params["emb_table"][input_ids]                                   # [B, F, d]
    alpha = jax.nn.softmax(params["region_logits"] / temperature, axis=-1)
    cum = jnp.cumsum(jnp.asarray(regions_dims))
    mask = (jnp.arange(all_dim)[None, :] < cum[:, None]).astype(jnp.float32)
    scale = alpha @ mask                                                   # [F, d]
    id_emb = raw * scale[None, :, :]
    x = id_emb.reshape(B, field_num * all_dim)
    h = jnp.maximum(x @ params["w1"] + params["b1"], 0.0)
    h = jnp.maximum(h @ params["w2"] + params["b2"], 0.0)
    logits = jnp.squeeze(h @ params["wp"] + params["bp"])
    return logits, h, id_emb


def _check(input_ids, params, cfg, block_batch):
    logits, out = irazor_dnn_forward(
        input_ids, params, field_num=cfg["field_num"],
        regions_dims=cfg["regions_dims"], temperature=cfg["temperature"],
        block_batch=block_batch)
    logits = jax.block_until_ready(logits)
    jax.block_until_ready(out["dnn_out"])
    jax.block_until_ready(out["id_emb"])

    ref_logits, ref_dnn, ref_emb = reference_forward(
        input_ids, params, field_num=cfg["field_num"],
        regions_dims=cfg["regions_dims"], temperature=cfg["temperature"])

    B = input_ids.shape[0]
    all_dim = sum(cfg["regions_dims"])
    assert logits.shape == (B,)
    assert out["dnn_out"].shape == (B, cfg["mlp_dims"][-1])
    assert out["id_emb"].shape == (B, cfg["field_num"], all_dim)
    # id_emb tolerance covers bf16 rounding of the scaled table; dnn/logits
    # tolerance covers bf16 matmul operands (W_eff, w2, activations).
    assert jnp.allclose(out["id_emb"], ref_emb, atol=1e-3), "id_emb mismatch"
    assert jnp.allclose(out["dnn_out"], ref_dnn, atol=2e-2), "dnn_out mismatch"
    assert jnp.allclose(logits, ref_logits, atol=2e-2), "logits mismatch"


# ------------------------- main -------------------------

if __name__ == "__main__":
    cfg = dict(
        field_num=4,
        field_feat_nums=[10, 10, 10, 10],
        regions_dims=(1, 2, 4),     # all_dim = 7
        temperature=1.0,
        mlp_dims=(32, 16),
    )
    id_feat_size = sum(cfg["field_feat_nums"])            # 40
    all_dim = sum(cfg["regions_dims"])
    emb_out_dim = all_dim * cfg["field_num"]               # 28

    key = jax.random.PRNGKey(0)
    k_ids, k_ids2, k_ids3, k_params = jax.random.split(key, 4)

    params = init_params(k_params, id_feat_size=id_feat_size,
                         field_num=cfg["field_num"],
                         regions_dims=cfg["regions_dims"],
                         emb_out_dim=emb_out_dim, mlp_dims=cfg["mlp_dims"])

    offsets = jnp.cumsum(jnp.asarray([0] + cfg["field_feat_nums"][:-1], dtype=jnp.int32))

    # small batch (single tile)
    batch = 8
    per_field = jax.random.randint(k_ids, (batch, cfg["field_num"]), 0,
                                   cfg["field_feat_nums"][0], dtype=jnp.int32)
    input_ids = per_field + offsets[None, :]
    _check(input_ids, params, cfg, block_batch=1024)

    # non-multiple batch (exercises batch padding + grid > 1)
    batch2 = 200
    per_field2 = jax.random.randint(k_ids2, (batch2, cfg["field_num"]), 0,
                                    cfg["field_feat_nums"][0], dtype=jnp.int32)
    input_ids2 = per_field2 + offsets[None, :]
    _check(input_ids2, params, cfg, block_batch=64)

    # larger batch with the default (large) tile: TB=512, grid=2 (two TC tiles)
    batch3 = 1024
    per_field3 = jax.random.randint(k_ids3, (batch3, cfg["field_num"]), 0,
                                    cfg["field_feat_nums"][0], dtype=jnp.int32)
    input_ids3 = per_field3 + offsets[None, :]
    _check(input_ids3, params, cfg, block_batch=1024)

    print("KERNEL_OK")
</pallas_src>

<mosaic_0001>
module attributes {stable_mosaic.version = 11 : i64} {
  func.func @irazor_dnn_kernel(%arg0: i32, %arg1: memref<8x4xi32, #tpu.memory_space<vmem>>, %arg2: memref<256x256xbf16, #tpu.memory_space<vmem>>, %arg3: memref<1x128xf32, #tpu.memory_space<vmem>>, %arg4: memref<128x128xbf16, #tpu.memory_space<vmem>>, %arg5: memref<1x128xf32, #tpu.memory_space<vmem>>, %arg6: memref<1x128xf32, #tpu.memory_space<vmem>>, %arg7: memref<1x1xf32, #tpu.memory_space<vmem>>, %arg8: memref<8x128xf32, #tpu.memory_space<vmem>>, %arg9: memref<8x128xf32, #tpu.memory_space<vmem>>) attributes {dimension_semantics = [#tpu.dimension_semantics<parallel>], iteration_bounds = array<i64: 1>, scalar_prefetch = 0 : i64, scratch_operands = 0 : i64, tpu.core_type = #tpu.core_type<tc>, window_params = [{transform_indices = @transform_0, window_bounds = array<i64: 8, 4>}, {pipeline_mode = #tpu.pipeline_mode<synchronous>, transform_indices = @transform_1, window_bounds = array<i64: 256, 256>}, {pipeline_mode = #tpu.pipeline_mode<synchronous>, transform_indices = @transform_2, window_bounds = array<i64: 1, 128>}, {pipeline_mode = #tpu.pipeline_mode<synchronous>, transform_indices = @transform_3, window_bounds = array<i64: 128, 128>}, {pipeline_mode = #tpu.pipeline_mode<synchronous>, transform_indices = @transform_4, window_bounds = array<i64: 1, 128>}, {pipeline_mode = #tpu.pipeline_mode<synchronous>, transform_indices = @transform_5, window_bounds = array<i64: 1, 128>}, {pipeline_mode = #tpu.pipeline_mode<synchronous>, transform_indices = @transform_6, window_bounds = array<i64: 1, 1>}, {transform_indices = @transform_7, window_bounds = array<i64: 8, 128>}, {transform_indices = @transform_8, window_bounds = array<i64: 8, 128>}]} {
    %c0 = arith.constant 0 : index
    %c0_0 = arith.constant 0 : index
    %0 = vector.load %arg1[%c0, %c0_0] : memref<8x4xi32, #tpu.memory_space<vmem>>, vector<8x4xi32>
    %1 = tpu.iota {dimensions = array<i32: 1>} : vector<8x256xi32>
    %2 = vector.extract_strided_slice %0 {offsets = [0, 0], sizes = [8, 1], strides = [1, 1]} : vector<8x4xi32> to vector<8x1xi32>
    %3 = vector.broadcast %2 : vector<8x1xi32> to vector<8x256xi32>
    %4 = arith.cmpi eq, %3, %1 : vector<8x256xi32>
    %5 = vector.extract_strided_slice %0 {offsets = [0, 1], sizes = [8, 1], strides = [1, 1]} : vector<8x4xi32> to vector<8x1xi32>
    %6 = vector.broadcast %5 : vector<8x1xi32> to vector<8x256xi32>
    %7 = arith.cmpi eq, %6, %1 : vector<8x256xi32>
    %8 = arith.ori %4, %7 : vector<8x256xi1>
    %9 = vector.extract_strided_slice %0 {offsets = [0, 2], sizes = [8, 1], strides = [1, 1]} : vector<8x4xi32> to vector<8x1xi32>
    %10 = vector.broadcast %9 : vector<8x1xi32> to vector<8x256xi32>
    %11 = arith.cmpi eq, %10, %1 : vector<8x256xi32>
    %12 = arith.ori %8, %11 : vector<8x256xi1>
    %13 = vector.extract_strided_slice %0 {offsets = [0, 3], sizes = [8, 1], strides = [1, 1]} : vector<8x4xi32> to vector<8x1xi32>
    %14 = vector.broadcast %13 : vector<8x1xi32> to vector<8x256xi32>
    %15 = arith.cmpi eq, %14, %1 : vector<8x256xi32>
    %16 = arith.ori %12, %15 : vector<8x256xi1>
    %17 = arith.extui %16 : vector<8x256xi1> to vector<8x256xi32>
    %18 = arith.sitofp %17 : vector<8x256xi32> to vector<8x256xf32>
    %19 = arith.truncf %18 : vector<8x256xf32> to vector<8x256xbf16>
    %c0_1 = arith.constant 0 : index
    %c0_2 = arith.constant 0 : index
    %20 = vector.load %arg2[%c0_1, %c0_2] : memref<256x256xbf16, #tpu.memory_space<vmem>>, vector<256x256xbf16>
    %cst = arith.constant dense<0.000000e+00> : vector<8x256xf32>
    %21 = tpu.matmul %19, %20, %cst {dimension_numbers = #tpu.dot_dimension_numbers<[1], [0], [0], [1], [0, 0, 1, 1], [], []>} : vector<8x256xbf16>, vector<256x256xbf16>, vector<8x256xf32> -> vector<8x256xf32>
    %22 = vector.extract_strided_slice %21 {offsets = [0, 0], sizes = [8, 128], strides = [1, 1]} : vector<8x256xf32> to vector<8x128xf32>
    %c0_3 = arith.constant 0 : index
    %c0_4 = arith.constant 0 : index
    %23 = vector.load %arg8[%c0_3, %c0_4] : memref<8x128xf32, #tpu.memory_space<vmem>>, vector<8x128xf32>
    tpu.vector_store %arg8[%c0_3, %c0_4], %22 {strides = array<i32>} : memref<8x128xf32, #tpu.memory_space<vmem>>, vector<8x128xf32>,
    %24 = vector.extract_strided_slice %21 {offsets = [0, 128], sizes = [8, 128], strides = [1, 1]} : vector<8x256xf32> to vector<8x128xf32>
    %c0_5 = arith.constant 0 : index
    %c0_6 = arith.constant 0 : index
    %25 = vector.load %arg3[%c0_5, %c0_6] : memref<1x128xf32, #tpu.memory_space<vmem>>, vector<1x128xf32>
    %26 = vector.broadcast %25 : vector<1x128xf32> to vector<8x128xf32>
    %27 = arith.addf %24, %26 : vector<8x128xf32>
    %cst_7 = arith.constant 0.000000e+00 : f32
    %28 = vector.broadcast %cst_7 : f32 to vector<8x128xf32>
    %29 = arith.maximumf %27, %28 : vector<8x128xf32>
    %30 = arith.truncf %29 : vector<8x128xf32> to vector<8x128xbf16>
    %c0_8 = arith.constant 0 : index
    %c0_9 = arith.constant 0 : index
    %31 = vector.load %arg4[%c0_8, %c0_9] : memref<128x128xbf16, #tpu.memory_space<vmem>>, vector<128x128xbf16>
    %cst_10 = arith.constant dense<0.000000e+00> : vector<8x128xf32>
    %32 = tpu.matmul %30, %31, %cst_10 {dimension_numbers = #tpu.dot_dimension_numbers<[1], [0], [0], [1], [0, 0, 1, 1], [], []>} : vector<8x128xbf16>, vector<128x128xbf16>, vector<8x128xf32> -> vector<8x128xf32>
    %c0_11 = arith.constant 0 : index
    %c0_12 = arith.constant 0 : index
    %33 = vector.load %arg5[%c0_11, %c0_12] : memref<1x128xf32, #tpu.memory_space<vmem>>, vector<1x128xf32>
    %34 = vector.broadcast %33 : vector<1x128xf32> to vector<8x128xf32>
    %35 = arith.addf %32, %34 : vector<8x128xf32>
    %cst_13 = arith.constant 0.000000e+00 : f32
    %36 = vector.broadcast %cst_13 : f32 to vector<8x128xf32>
    %37 = arith.maximumf %35, %36 : vector<8x128xf32>
    %c0_14 = arith.constant 0 : index
    %c0_15 = arith.constant 0 : index
    %38 = vector.load %arg6[%c0_14, %c0_15] : memref<1x128xf32, #tpu.memory_space<vmem>>, vector<1x128xf32>
    %39 = vector.broadcast %38 : vector<1x128xf32> to vector<8x128xf32>
    %40 = arith.mulf %37, %39 : vector<8x128xf32>
    %cst_16 = arith.constant dense<0.000000e+00> : vector<8xf32>
    %41 = vector.multi_reduction <add>, %40, %cst_16 [1] : vector<8x128xf32> to vector<8xf32>
    %42 = vector.shape_cast %41 : vector<8xf32> to vector<8x1xf32>
    %c0_17 = arith.constant 0 : index
    %c0_18 = arith.constant 0 : index
    %43 = vector.load %arg7[%c0_17, %c0_18] : memref<1x1xf32, #tpu.memory_space<vmem>>, vector<1x1xf32>
    %44 = vector.broadcast %43 : vector<1x1xf32> to vector<8x1xf32>
    %45 = arith.addf %42, %44 : vector<8x1xf32>
    %46 = tpu.iota {dimensions = array<i32: 1>} : vector<8x128xi32>
    %c16_i32 = arith.constant 16 : i32
    %47 = vector.broadcast %c16_i32 : i32 to vector<8x128xi32>
    %48 = arith.cmpi eq, %46, %47 : vector<8x128xi32>
    %49 = vector.shape_cast %45 : vector<8x1xf32> to vector<8x1xf32>
    %50 = vector.broadcast %49 : vector<8x1xf32> to vector<8x128xf32>
    %51 = arith.select %48, %50, %37 : vector<8x128xi1>, vector<8x128xf32>
    %c0_19 = arith.constant 0 : index
    %c0_20 = arith.constant 0 : index
    %52 = vector.load %arg9[%c0_19, %c0_20] : memref<8x128xf32, #tpu.memory_space<vmem>>, vector<8x128xf32>
    tpu.vector_store %arg9[%c0_19, %c0_20], %51 {strides = array<i32>} : memref<8x128xf32, #tpu.memory_space<vmem>>, vector<8x128xf32>,
    return
  }
  func.func @transform_0(%arg0: i32) -> (i32, i32) {
    %c0_i32 = arith.constant 0 : i32
    %c0_i32_0 = arith.constant 0 : i32
    return %arg0, %c0_i32 : i32, i32
  }
  func.func @transform_1(%arg0: i32) -> (i32, i32) {
    %c0_i32 = arith.constant 0 : i32
    %c0_i32_0 = arith.constant 0 : i32
    %c0_i32_1 = arith.constant 0 : i32
    return %c0_i32, %c0_i32_0 : i32, i32
  }
  func.func @transform_2(%arg0: i32) -> (i32, i32) {
    %c0_i32 = arith.constant 0 : i32
    %c0_i32_0 = arith.constant 0 : i32
    %c0_i32_1 = arith.constant 0 : i32
    return %c0_i32, %c0_i32_0 : i32, i32
  }
  func.func @transform_3(%arg0: i32) -> (i32, i32) {
    %c0_i32 = arith.constant 0 : i32
    %c0_i32_0 = arith.constant 0 : i32
    %c0_i32_1 = arith.constant 0 : i32
    return %c0_i32, %c0_i32_0 : i32, i32
  }
  func.func @transform_4(%arg0: i32) -> (i32, i32) {
    %c0_i32 = arith.constant 0 : i32
    %c0_i32_0 = arith.constant 0 : i32
    %c0_i32_1 = arith.constant 0 : i32
    return %c0_i32, %c0_i32_0 : i32, i32
  }
  func.func @transform_5(%arg0: i32) -> (i32, i32) {
    %c0_i32 = arith.constant 0 : i32
    %c0_i32_0 = arith.constant 0 : i32
    %c0_i32_1 = arith.constant 0 : i32
    return %c0_i32, %c0_i32_0 : i32, i32
  }
  func.func @transform_6(%arg0: i32) -> (i32, i32) {
    %c0_i32 = arith.constant 0 : i32
    %c0_i32_0 = arith.constant 0 : i32
    %c0_i32_1 = arith.constant 0 : i32
    return %c0_i32, %c0_i32_0 : i32, i32
  }
  func.func @transform_7(%arg0: i32) -> (i32, i32) {
    %c0_i32 = arith.constant 0 : i32
    %c0_i32_0 = arith.constant 0 : i32
    return %arg0, %c0_i32 : i32, i32
  }
  func.func @transform_8(%arg0: i32) -> (i32, i32) {
    %c0_i32 = arith.constant 0 : i32
    %c0_i32_0 = arith.constant 0 : i32
    return %arg0, %c0_i32 : i32, i32
  }
}

</mosaic_0001>

<bundles_post_ra>
// kernel: tpu_custom_call.1
= control target key start
LH: loop header
LB: loop body
LE: loop exit
PB: predicated region body
PF: predicated region fallthrough
CT: control target
= control target key end

     0   :  { %s900_s0 = inlined_call_operand.vmem [shape: s32[8,4], index: 0, kind: input, shape index: {}]   ;;  %s901_s1 = inlined_call_operand.hbm [shape: bf16[256,256], index: 1, kind: input, shape index: {}]   ;;  %s902_s2 = inlined_call_operand.vmem [shape: f32[1,128], index: 2, kind: input, shape index: {}]   ;;  %s903_s3 = inlined_call_operand.hbm [shape: bf16[128,128], index: 3, kind: input, shape index: {}]   ;;  %s904_s4 = inlined_call_operand.vmem [shape: f32[1,128], index: 4, kind: input, shape index: {}]   ;;  %s905_s5 = inlined_call_operand.vmem [shape: f32[1,128], index: 5, kind: input, shape index: {}]   ;;  %s906_s6 = inlined_call_operand.<no memory space> [shape: f32[1,1], index: 6, kind: input, shape index: {}]   ;;  %s907_s7 = inlined_call_operand.hbm [shape: f32[8,128], index: 7, kind: output, shape index: {0}]   ;;  %s908_s8 = inlined_call_operand.hbm [shape: f32[8,128], index: 8, kind: output, shape index: {1}]  }
   0x1   :  { %v14_v0 = vstv %s906_s6 }
   0x2   :  { %15 = vst [vmem:[#allocation2] sm:$0x1] %v14_v0 }
   0x3   :  { %16 = vsyncpa [#allocation4], 0 }
   0x4   :  { %17 = vsyncpa [#allocation7], 0 }
   0x5   :  { %18 = vsyncpa [#allocation5], 0 }
   0x6   :  { %19 = vsyncpa [#allocation10], 0  ;;  %s760_s29 = smov [#allocation3]   ;;  %s664_s11 = scalar_lea.hbm %s901_s1, 4096 }
   0x7   :  { %s27_s30 = sshll.u32 %s760_s29, 4  ;;  %p665_p0 = scmp.ne.s32.totalorder %s901_s1, %s664_s11  ;;  %s28_s30 = int_to_ptr.vmem [resolvable:$true] %s27_s30 }
   0x8   :  { %p668_p1 = scmp.lt.u32.totalorder %s664_s11, %s901_s1 }
   0xa   :  { %p670_p2 = pnand %p668_p1, %p665_p0 }
   0xc   :  { %673 = shalt.err (!%p670_p2)
}
   0xd   :  { %s674_s6 = scalar_lea.vmem %s28_s30, 4096  ;;  %p679_p4 = scmp.lt.s32.totalorder %s28_s30, %s28_s30 }
   0xe   :  { %p675_p3 = scmp.ne.s32.totalorder %s28_s30, %s674_s6  ;;  %p680_p5 = scmp.lt.s32.totalorder %s674_s6, %s674_s6 }
  0x10   :  { %p681_p6 = por %p680_p5, %p679_p4 }
  0x12   :  { %p682_p7 = pnand %p681_p6, %p675_p3 }
  0x14   :  { %685 = shalt.err (!%p682_p7)
}
  0x15   :  { %s761_s16 = smov 128   ;;  %s762_s17 = smov 8  }
  0x16   :  { %33 = dma.hbm_to_vmem [thread:$0]  %s901_s1, 4096, %s28_s30, [#allocation4], %s761_s16, %s761_s16, %s762_s17  }
  0x17   :  { %s763_s20 = smov [#allocation6]   ;;  %s686_s24 = scalar_lea.hbm %s903_s3, 1024 }
  0x18   :  { %s41_s21 = sshll.u32 %s763_s20, 4  ;;  %p687_p8 = scmp.ne.s32.totalorder %s903_s3, %s686_s24  ;;  %s42_s21 = int_to_ptr.vmem [resolvable:$true] %s41_s21 }
  0x19   :  { %p690_p9 = scmp.lt.u32.totalorder %s686_s24, %s903_s3 }
  0x1b   :  { %p692_p10 = pnand %p690_p9, %p687_p8 }
  0x1d   :  { %695 = shalt.err (!%p692_p10)
}
  0x1e   :  { %s696_s29 = scalar_lea.vmem %s42_s21, 1024  ;;  %p701_p12 = scmp.lt.s32.totalorder %s42_s21, %s42_s21 }
  0x1f   :  { %p697_p11 = scmp.ne.s32.totalorder %s42_s21, %s696_s29  ;;  %p702_p13 = scmp.lt.s32.totalorder %s696_s29, %s696_s29 }
  0x21   :  { %p703_p0 = por %p702_p13, %p701_p12 }
  0x23   :  { %p704_p1 = pnand %p703_p0, %p697_p11 }
  0x25   :  { %707 = shalt.err (!%p704_p1)
}
  0x26   :  { %s764_s1 = smov 64   ;;  %s765_s30 = smov 4  }
  0x27   :  { %47 = dma.hbm_to_vmem [thread:$0]  %s903_s3, 1024, %s42_s21, [#allocation7], %s764_s1, %s764_s1, %s765_s30  }
  0x28   :  { %752 = dma.done.wait [#allocation4], 4096  }
  0x29   :  { %753 = vsyncadd [#allocation4], 4294963200 }
  0x2a   :  { %754 = dma.done.wait [#allocation7], 1024  }
  0x2b   :  { %755 = vsyncadd [#allocation7], 4294966272  ;;  %v766_v1 = vmov 0   ;;  %v767_v2 = vmov 2   ;;  %v61_v3 = vld [vmem:[%s900_s0] sm:$0xff]  ;;  %v768_v8 = vmov 1   ;;  %v62_v45 = vlaneseq }
  0x2c   :  { %603 = vset.pattern.permute.xlu0 %v766_v1  ;;  %605 = vset.pattern.permute.xlu1 %v767_v2  ;;  %v608_v4 = vld [vmem:[#allocation3 + $0x4] ss:$8 sps:$4 sm:$0xff]   ;;  %v610_v5 = vld [vmem:[#allocation3] ss:$8 sps:$4 sm:$0xff]   ;;  %v611_v6 = vld [vmem:[#allocation3 + $0x14] ss:$8 sps:$4 sm:$0xff]  }
  0x2d   :  { %66 = vperm.xlu0 %603, %v61_v3   ;;  %78 = vperm.xlu1 %605, %v61_v3   ;;  %v613_v7 = vld [vmem:[#allocation3 + $0x10] ss:$8 sps:$4 sm:$0xff]   ;;  %v769_v9 = vmov 3   ;;  %v614_v10 = vld [vmem:[#allocation3 + $0x24] ss:$8 sps:$4 sm:$0xff]   ;;  %v770_v17 = vmov 0.0  }
  0x2e   :  { %289 = vmatprep.subr.bf16.mxu0 %v608_v4  ;;  %v616_v11 = vld [vmem:[#allocation3 + $0x20] ss:$8 sps:$4 sm:$0xff]   ;;  %v617_v12 = vld [vmem:[#allocation3 + $0x34] ss:$8 sps:$4 sm:$0xff]   ;;  %v619_v13 = vld [vmem:[#allocation3 + $0x30] ss:$8 sps:$4 sm:$0xff]   ;;  %568 = vmatprep.subr.bf16.mxu1 %v770_v17 }
  0x2f   :  { %290 = vmatpush1.bf16.msra.mxu0 %v610_v5  ;;  %v620_v14 = vld [vmem:[#allocation3 + $0x44] ss:$8 sps:$4 sm:$0xff]   ;;  %v622_v15 = vld [vmem:[#allocation3 + $0x40] ss:$8 sps:$4 sm:$0xff]   ;;  %v623_v16 = vld [vmem:[#allocation3 + $0x54] ss:$8 sps:$4 sm:$0xff]  }
  0x30   :  { %291 = vmatprep.subr.bf16.mxu0 %v611_v6  ;;  %v625_v18 = vld [vmem:[#allocation3 + $0x50] ss:$8 sps:$4 sm:$0xff]   ;;  %v626_v19 = vld [vmem:[#allocation3 + $0x64] ss:$8 sps:$4 sm:$0xff]   ;;  %v628_v21 = vld [vmem:[#allocation3 + $0x60] ss:$8 sps:$4 sm:$0xff]  }
  0x31   :  { %604 = vset.pattern.permute.xlu0 %v768_v8  ;;  %606 = vset.pattern.permute.xlu1 %v769_v9  ;;  %v656_v20 = vld [vmem:[#allocation6] sm:$0xff]   ;;  %v657_v22 = vld [vmem:[#allocation6 + $0x8] sm:$0xff]   ;;  %v629_v23 = vld [vmem:[#allocation3 + $0x74] ss:$8 sps:$4 sm:$0xff]   ;;  %v857_v48 = vand.u32 127, %v62_v45 }
  0x32   :  { %71 = vperm.xlu0 %604, %v61_v3   ;;  %85 = vperm.xlu1 %606, %v61_v3   ;;  %v631_v24 = vld [vmem:[#allocation3 + $0x70] ss:$8 sps:$4 sm:$0xff]   ;;  %v632_v26 = vld [vmem:[#allocation3 + $0x84] ss:$8 sps:$4 sm:$0xff]   ;;  %v634_v27 = vld [vmem:[#allocation3 + $0x80] ss:$8 sps:$4 sm:$0xff]  }
  0x33   :  { %292 = vmatpush1.bf16.msra.mxu0 %v613_v7  ;;  %569 = vmatpush3.bf16.msra.mxu1 %v656_v20  ;;  %v658_v25 = vld [vmem:[#allocation6 + $0x10] sm:$0xff]   ;;  %v659_v28 = vld [vmem:[#allocation6 + $0x18] sm:$0xff]   ;;  %v660_v31 = vld [vmem:[#allocation6 + $0x20] sm:$0xff]   ;;  %v64_v51 = vadd.s32 128, %v857_v48  ;;  %v771_v52 = vmov 1.0|1.0  }
  0x34   :  { %293 = vmatprep.subr.bf16.mxu0 %v614_v10  ;;  %570 = vmatprep.subr.bf16.mxu1 %v770_v17  ;;  %v635_v29 = vld [vmem:[#allocation3 + $0x94] ss:$8 sps:$4 sm:$0xff]   ;;  %v637_v30 = vld [vmem:[#allocation3 + $0x90] ss:$8 sps:$4 sm:$0xff]   ;;  %v638_v32 = vld [vmem:[#allocation3 + $0xa4] ss:$8 sps:$4 sm:$0xff]  }
  0x35   :  { %v640_v33 = vld [vmem:[#allocation3 + $0xa0] ss:$8 sps:$4 sm:$0xff]   ;;  %v641_v35 = vld [vmem:[#allocation3 + $0xb4] ss:$8 sps:$4 sm:$0xff]   ;;  %v643_v36 = vld [vmem:[#allocation3 + $0xb0] ss:$8 sps:$4 sm:$0xff]  }
  0x36   :  { %607 = vset.pattern.permute.xlu0 %v766_v1  ;;  %v661_v34 = vld [vmem:[#allocation6 + $0x28] sm:$0xff]   ;;  %v647_v39 = vld [vmem:[#allocation3 + $0xd4] ss:$8 sps:$4 sm:$0xff]   ;;  %v649_v40 = vld [vmem:[#allocation3 + $0xd0] ss:$8 sps:$4 sm:$0xff]  }
  0x37   :  { %294 = vmatpush1.bf16.msra.mxu0 %v616_v11  ;;  %571 = vmatpush3.bf16.msra.mxu1 %v657_v22  ;;  %v644_v37 = vld [vmem:[#allocation3 + $0xc4] ss:$8 sps:$4 sm:$0xff]   ;;  %v646_v38 = vld [vmem:[#allocation3 + $0xc0] ss:$8 sps:$4 sm:$0xff]   ;;  %v653_v43 = vld [vmem:[#allocation3 + $0xf4] ss:$8 sps:$4 sm:$0xff]  }
  0x38   :  { %295 = vmatprep.subr.bf16.mxu0 %v617_v12  ;;  %572 = vmatprep.subr.bf16.mxu1 %v770_v17  ;;  %v650_v41 = vld [vmem:[#allocation3 + $0xe4] ss:$8 sps:$4 sm:$0xff]   ;;  %v652_v42 = vld [vmem:[#allocation3 + $0xe0] ss:$8 sps:$4 sm:$0xff]   ;;  %v655_v44 = vld [vmem:[#allocation3 + $0xf0] ss:$8 sps:$4 sm:$0xff]  }
  0x39   :  { %v662_v53 = vld [vmem:[#allocation6 + $0x30] sm:$0xff]   ;;  %v663_v54 = vld [vmem:[#allocation6 + $0x38] sm:$0xff]  }
  0x3a   :  { %v547_v55 = vld [vmem:[%s902_s2] ss:$0 sm:$0xff]  ;;  %s773_s2 = smov [#allocation8]  }
  0x3b   :  { %296 = vmatpush1.bf16.msra.mxu0 %v619_v13  ;;  %573 = vmatpush3.bf16.msra.mxu1 %v658_v25  ;;  %v548_v63 = vld [vmem:[%s904_s4] ss:$0 sm:$0xff]  ;;  %s485_s16 = sshll.u32 %s773_s2, 4  ;;  %s486_s16 = int_to_ptr.vmem [resolvable:$true] %s485_s16 }
  0x3c   :  { %297 = vmatprep.subr.bf16.mxu0 %v620_v14  ;;  %574 = vmatprep.subr.bf16.mxu1 %v770_v17  ;;  %v557_v4 = vld [vmem:[%s905_s5] ss:$0 sm:$0xff]  ;;  %s708_s4 = scalar_lea.vmem %s486_s16, 128  ;;  %p713_p3 = scmp.lt.s32.totalorder %s486_s16, %s486_s16 }
  0x3d   :  { %v558_v8 = vld [vmem:[#allocation2] ss:$0 sm:$0xff]  ;;  %p709_p2 = scmp.ne.s32.totalorder %s486_s16, %s708_s4  ;;  %p714_p4 = scmp.lt.s32.totalorder %s708_s4, %s708_s4 }
  0x3f   :  { %298 = vmatpush1.bf16.msra.mxu0 %v622_v15  ;;  %575 = vmatpush3.bf16.msra.mxu1 %v659_v28  ;;  %p715_p5 = por %p714_p4, %p713_p3 }
  0x40   :  { %299 = vmatprep.subr.bf16.mxu0 %v623_v16  ;;  %576 = vmatprep.subr.bf16.mxu1 %v770_v17 }
  0x41   :  { %p716_p6 = pnand %p715_p5, %p709_p2 }
  0x43   :  { %300 = vmatpush1.bf16.msra.mxu0 %v625_v18  ;;  %577 = vmatpush3.bf16.msra.mxu1 %v660_v31 }
  0x44   :  { %301 = vmatprep.subr.bf16.mxu0 %v626_v19  ;;  %578 = vmatprep.subr.bf16.mxu1 %v770_v17 }
  0x47   :  { %302 = vmatpush1.bf16.msra.mxu0 %v628_v21  ;;  %579 = vmatpush3.bf16.msra.mxu1 %v661_v34 }
  0x48   :  { %303 = vmatprep.subr.bf16.mxu0 %v629_v23  ;;  %580 = vmatprep.subr.bf16.mxu1 %v770_v17 }
  0x4b   :  { %304 = vmatpush1.bf16.msra.mxu0 %v631_v24  ;;  %581 = vmatpush3.bf16.msra.mxu1 %v662_v53 }
  0x4c   :  { %305 = vmatprep.subr.bf16.mxu0 %v632_v26  ;;  %582 = vmatprep.subr.bf16.mxu1 %v770_v17 }
  0x4f   :  { %306 = vmatpush1.bf16.msra.mxu0 %v634_v27  ;;  %583 = vmatpush3.bf16.msra.mxu1 %v663_v54 }
  0x50   :  { %307 = vmatprep.subr.bf16.mxu0 %v635_v29 }
  0x53   :  { %308 = vmatpush1.bf16.msra.mxu0 %v637_v30 }
  0x54   :  { %309 = vmatprep.subr.bf16.mxu0 %v638_v32 }
  0x57   :  { %310 = vmatpush1.bf16.msra.mxu0 %v640_v33 }
  0x58   :  { %311 = vmatprep.subr.bf16.mxu0 %v641_v35 }
  0x5b   :  { %312 = vmatpush1.bf16.msra.mxu0 %v643_v36 }
  0x5c   :  { %313 = vmatprep.subr.bf16.mxu0 %v644_v37 }
  0x5f   :  { %314 = vmatpush1.bf16.msra.mxu0 %v646_v38 }
  0x60   :  { %315 = vmatprep.subr.bf16.mxu0 %v647_v39 }
  0x63   :  { %316 = vmatpush1.bf16.msra.mxu0 %v649_v40 }
  0x64   :  { %317 = vmatprep.subr.bf16.mxu0 %v650_v41 }
  0x67   :  { %318 = vmatpush1.bf16.msra.mxu0 %v652_v42 }
  0x68   :  { %319 = vmatprep.subr.bf16.mxu0 %v653_v43 }
  0x6b   :  { %320 = vmatpush1.bf16.msra.mxu0 %v655_v44 }
  0xac   :  { %v67_v46 = vpop.permute.xlu0 %66  ;;  %v79_v47 = vpop.permute.xlu1 %78 }
  0xad   :  { %vm68_vm0 = vcmp.eq.s32.totalorder %v67_v46, %v857_v48  ;;  %vm80_vm3 = vcmp.eq.s32.totalorder %v79_v47, %v857_v48  ;;  %vm69_vm8 = vcmp.eq.s32.totalorder %v67_v46, %v64_v51  ;;  %vm81_vm11 = vcmp.eq.s32.totalorder %v79_v47, %v64_v51 }
  0xb1   :  { %v72_v49 = vpop.permute.xlu0 %71  ;;  %v86_v50 = vpop.permute.xlu1 %85 }
  0xb2   :  { %vm73_vm1 = vcmp.eq.s32.totalorder %v72_v49, %v857_v48  ;;  %vm87_vm2 = vcmp.eq.s32.totalorder %v86_v50, %v857_v48  ;;  %vm74_vm5 = vcmp.eq.s32.totalorder %v72_v49, %v64_v51  ;;  %vm88_vm10 = vcmp.eq.s32.totalorder %v86_v50, %v64_v51 }
  0xb3   :  { %vm75_vm4 = vmor %vm68_vm0, %vm73_vm1  ;;  %vm772_vm0 = vmmov 0  }
  0xb4   :  { %vm82_vm6 = vmor %vm75_vm4, %vm80_vm3  ;;  %584 = vmatprep.mubr.msk.bf16.mxu1 %vm772_vm0, %v770_v17 }
  0xb5   :  { %vm89_vm7 = vmor %vm82_vm6, %vm87_vm2 }
  0xb6   :  { %vm545_vm9 = vmpackc.low %vm89_vm7, %vm89_vm7 }
  0xb7   :  { %vm76_vm12 = vmor %vm69_vm8, %vm74_vm5 }
  0xb8   :  { %vm83_vm13 = vmor %vm76_vm12, %vm81_vm11 }
  0xb9   :  { %vm90_vm14 = vmor %vm83_vm13, %vm88_vm10 }
  0xba   :  { %vm543_vm15 = vmpackc.low %vm90_vm14, %vm90_vm14 }
  0xbb   :  { %544 = vmatprep.mubr.msk.bf16.mxu0 %vm543_vm15, %v771_v52 }
  0xbc   :  { %546 = vmatmul.mubr.msk.bf16.vlgmr.msra.gmra.mrb[0].mxu0 %vm545_vm9, %v771_v52 }
 0x18f   :  { %v323_v56 = vpop.f32.mrb[0].mxu0 }
 0x190   :  { %330 = vst [vmem:[#allocation8] sm:$0xff] %v323_v56  ;;  %v325_v57 = vpop.f32.mrb[1].mxu0 }
 0x191   :  { %v338_v58 = vadd.f32 %v547_v55, %v325_v57  ;;  %v327_v59 = vpop.f32.mrb[2].mxu0 }
 0x192   :  { %v328_v60 = vpop.f32.mrb[3].mxu0 }
 0x193   :  { %v339_v61 = vmax.f32 %v338_v58, 0.0 }
 0x195   :  { %v340_v62 = vpack.c.bf16 %v339_v61, %v339_v61 }
 0x197   :  { %585 = vmatmul.mubr.bf16.vlgmr.msra.gmra.mrb[0].mxu1 %v340_v62 }
 0x26a   :  { %v446_v0 = vpop.f32.mrb[0].mxu1 }
 0x26b   :  { %v447_v1 = vadd.f32 %v548_v63, %v446_v0  ;;  %v586_v2 = vpop.f32.mrb[1].mxu1 }
 0x26c   :  { %v449_v3 = vpop.f32.mrb[2].mxu1 }
 0x26d   :  { %v452_v5 = vmax.f32 %v447_v1, 0.0  ;;  %v587_v6 = vpop.f32.mrb[3].mxu1 }
 0x26f   :  { %v460_v7 = vmul.f32 %v557_v4, %v452_v5 }
 0x271   :  { %461 = vadd.xlane.f32.xlu1 %v460_v7 }
 0x2fe   :  { %v462_v9 = vpop.xlane.xlu1 %461 }
 0x2ff   :  { %v470_v10 = vadd.f32 %v558_v8, %v462_v9 }
 0x301   :  { %474 = vperm.xlu0 %607, %v470_v10  }
 0x302   :  { %719 = shalt.err (!%p716_p6)
}
 0x303   :  { %s720_s18 = scalar_lea.hbm %s907_s7, 128 }
 0x304   :  { %p721_p7 = scmp.ne.s32.totalorder %s907_s7, %s720_s18  ;;  %p724_p8 = scmp.lt.u32.totalorder %s720_s18, %s907_s7 }
 0x306   :  { %p726_p9 = pnand %p724_p8, %p721_p7 }
 0x308   :  { %729 = shalt.err (!%p726_p9)
}
 0x309   :  { %488 = dma.vmem_to_hbm [thread:$0]  %s486_s16, 128, %s907_s7, [#allocation5]   ;;  %vm471_vm1 = vcmp.eq.s32.totalorder %v857_v48, 16 }
 0x30a   :  { %s774_s25 = smov [#allocation9]  }
 0x30b   :  { %s495_s26 = sshll.u32 %s774_s25, 4  ;;  %s496_s26 = int_to_ptr.vmem [resolvable:$true] %s495_s26 }
 0x30c   :  { %s730_s27 = scalar_lea.vmem %s496_s26, 128  ;;  %p735_p11 = scmp.lt.s32.totalorder %s496_s26, %s496_s26 }
 0x30d   :  { %p731_p10 = scmp.ne.s32.totalorder %s496_s26, %s730_s27  ;;  %p736_p12 = scmp.lt.s32.totalorder %s730_s27, %s730_s27 }
 0x30f   :  { %p737_p13 = por %p736_p12, %p735_p11 }
 0x311   :  { %p738_p0 = pnand %p737_p13, %p731_p10 }
 0x380   :  { %v475_v11 = vpop.permute.xlu0 %474 }
 0x381   :  { %v477_v12 = vsel %vm471_vm1, %v475_v11, %v452_v5 }
 0x382   :  { %478 = vst [vmem:[#allocation9] sm:$0xff] %v477_v12 }
 0x383   :  { %741 = shalt.err (!%p738_p0)
}
 0x384   :  { %s742_s1 = scalar_lea.hbm %s908_s8, 128 }
 0x385   :  { %p743_p1 = scmp.ne.s32.totalorder %s908_s8, %s742_s1  ;;  %p746_p2 = scmp.lt.u32.totalorder %s742_s1, %s908_s8 }
 0x387   :  { %p748_p3 = pnand %p746_p2, %p743_p1 }
 0x389   :  { %751 = shalt.err (!%p748_p3)
}
 0x38a   :  { %498 = dma.vmem_to_hbm [thread:$0]  %s496_s26, 128, %s908_s8, [#allocation10]  }
 0x38b   :  { %756 = dma.done.wait [#allocation5], 128  }
 0x38c   :  { %757 = vsyncadd [#allocation5], 4294967168 }
 0x38d   :  { %758 = dma.done.wait [#allocation10], 128  }
 0x38e   :  { %759 = vsyncadd [#allocation10], 4294967168 }
 0x38f   :  { %505 = vsyncpa [#allocation4], 1 }
 0x390   :  { %506 = vsyncpa [#allocation7], 1 }
 0x391   :  { %507 = vsyncpa [#allocation5], 1 }
 0x392   :  { %508 = vsyncpa [#allocation10], 1 }

</bundles_post_ra>
